<compile_context>
chip_gen: v7x
topology: tpu7x:2x2x1
jax: 0.10.0
libtpu: 0.0.40
codegen_flags: <defaults>
</compile_context>

<pallas_src>
import jax
import jax.numpy as jnp
from jax import lax
from jax.experimental import pallas as pl
from jax.experimental.pallas import tpu as pltpu

LANES = 128
MAX_ROW_TILE = 2048              # (2048, 128) f32 block = 1 MiB per input per buffer
STATE_RESIDENT_MAX_ROWS = 2048   # keep state pair resident in VMEM if <= 1 MiB each


# ----------------------------------------------------------------------------
# Slab preparation (wrapper-side, minimal copies)
# ----------------------------------------------------------------------------
def _to_slab(x):
    """Flatten to a lane-dense (rows, 128) slab in the input's dtype.

    Free (bitcast reshape) when x.size % 128 == 0; otherwise only the <128-element
    ragged tail is zero-padded (both operands padded with zeros -> diff is 0).
    Returns (slab, n_elements, n_rows)."""
    n = x.size
    xf = jnp.ravel(x)
    rows = pl.cdiv(n, LANES)
    pad = rows * LANES - n
    if pad:
        xf = jnp.pad(xf, (0, pad))
    return xf.reshape(rows, LANES), n, rows


def _row_tile(rows):
    """Largest legal row tile: the full slab if it fits one block, else 2048 rows.

    (Block last-two-dims constraint: tile is either a multiple of 8/16/32 rows
    (2048) or exactly the full array extent, and the lane dim is always 128.)"""
    return rows if rows <= MAX_ROW_TILE else MAX_ROW_TILE


def _accum_tile(acc_ref, x_ref, y_ref, valid_rows):
    """acc += (x - y)^2 for the in-bounds rows of the current tile (pure VPU)."""
    tile = acc_ref.shape[0]
    d = x_ref[...].astype(jnp.float32) - y_ref[...].astype(jnp.float32)
    sq = d * d

    @pl.when(valid_rows >= tile)          # common case: full tile, plain add
    def _():
        acc_ref[...] += sq

    @pl.when(valid_rows < tile)           # ragged last tile: mask OOB rows
    def _():
        row_ids = lax.broadcasted_iota(jnp.int32, sq.shape, 0)
        acc_ref[...] += jnp.where(row_ids < valid_rows, sq, 0.0)


# ----------------------------------------------------------------------------
# Generic single-pair sum-of-squared-differences kernel (fallback / standalone)
# ----------------------------------------------------------------------------
def _mse_sum_kernel(nrows_ref, x_ref, y_ref, out_ref, acc_ref):
    i = pl.program_id(0)
    num = pl.num_programs(0)
    tile = acc_ref.shape[0]

    @pl.when(i == 0)
    def _():
        acc_ref[...] = jnp.zeros_like(acc_ref)

    _accum_tile(acc_ref, x_ref, y_ref, nrows_ref[0] - i * tile)

    @pl.when(i == num - 1)                # single final reduction + SMEM write
    def _():
        out_ref[0, 0] = jnp.sum(acc_ref[...])


def _mse_from_slab(xs, ys, n, rows):
    tile = _row_tile(rows)
    grid = (pl.cdiv(rows, tile),)
    nrows = jnp.array([rows], jnp.int32)

    ssq = pl.pallas_call(
        _mse_sum_kernel,
        out_shape=jax.ShapeDtypeStruct((1, 1), jnp.float32),
        grid_spec=pltpu.PrefetchScalarGridSpec(
            num_scalar_prefetch=1,
            grid=grid,
            in_specs=[
                pl.BlockSpec((tile, LANES), lambda i, nr: (i, 0)),
                pl.BlockSpec((tile, LANES), lambda i, nr: (i, 0)),
            ],
            out_specs=pl.BlockSpec((1, 1), lambda i, nr: (0, 0),
                                   memory_space=pltpu.SMEM),
            scratch_shapes=[pltpu.VMEM((tile, LANES), jnp.float32)],
        ),
        compiler_params=pltpu.CompilerParams(
            dimension_semantics=("arbitrary",),   # reduction axis
        ),
    )(nrows, xs, ys)
    return ssq[0, 0] / jnp.float32(n)


def mse_pallas(x, y):
    """Mean squared error between two same-shaped arrays via a Pallas reduction."""
    assert x.shape == y.shape, (x.shape, y.shape)
    xs, n, rows = _to_slab(x)
    ys, _, _ = _to_slab(y)
    return _mse_from_slab(xs, ys, n, rows)


# ----------------------------------------------------------------------------
# Fused IM2IM kernel: one launch, two scalar outputs
# ----------------------------------------------------------------------------
def _im2im_kernel(nrows_img_ref, s_ref, sh_ref, x_ref, y_ref, out_ref, acc_ref):
    i = pl.program_id(0)
    num = pl.num_programs(0)
    tile = acc_ref.shape[0]

    @pl.when(i == 0)
    def _():
        acc_ref[...] = jnp.zeros_like(acc_ref)
        # State pair is a full resident block (no OOB rows); reduce it once.
        ds = s_ref[...].astype(jnp.float32) - sh_ref[...].astype(jnp.float32)
        out_ref[0, 0] = jnp.sum(ds * ds)

    _accum_tile(acc_ref, x_ref, y_ref, nrows_img_ref[0] - i * tile)

    @pl.when(i == num - 1)
    def _():
        out_ref[1, 0] = jnp.sum(acc_ref[...])


@jax.jit
def im2im_loss(state, state_hat, image, image_hat):
    """Forward pass of IM2IMLoss: (loss, loss_state, loss_image)."""
    assert state.shape == state_hat.shape, (state.shape, state_hat.shape)
    assert image.shape == image_hat.shape, (image.shape, image_hat.shape)

    ss, n_s, rows_s = _to_slab(state)
    sh, _, _ = _to_slab(state_hat)
    xs, n_i, rows_i = _to_slab(image)
    ys, _, _ = _to_slab(image_hat)

    if rows_s <= STATE_RESIDENT_MAX_ROWS:
        # Fused path: single launch, state pair resident, image pair streamed.
        tile = _row_tile(rows_i)
        grid = (pl.cdiv(rows_i, tile),)
        nrows = jnp.array([rows_i], jnp.int32)

        ssq = pl.pallas_call(
            _im2im_kernel,
            out_shape=jax.ShapeDtypeStruct((2, 1), jnp.float32),
            grid_spec=pltpu.PrefetchScalarGridSpec(
                num_scalar_prefetch=1,
                grid=grid,
                in_specs=[
                    pl.BlockSpec((rows_s, LANES), lambda i, nr: (0, 0)),  # resident
                    pl.BlockSpec((rows_s, LANES), lambda i, nr: (0, 0)),  # resident
                    pl.BlockSpec((tile, LANES), lambda i, nr: (i, 0)),
                    pl.BlockSpec((tile, LANES), lambda i, nr: (i, 0)),
                ],
                out_specs=pl.BlockSpec((2, 1), lambda i, nr: (0, 0),
                                       memory_space=pltpu.SMEM),
                scratch_shapes=[pltpu.VMEM((tile, LANES), jnp.float32)],
            ),
            compiler_params=pltpu.CompilerParams(
                dimension_semantics=("arbitrary",),
            ),
        )(nrows, ss, sh, xs, ys)
        loss_state = ssq[0, 0] / jnp.float32(n_s)
        loss_image = ssq[1, 0] / jnp.float32(n_i)
    else:
        # State too large to keep resident in one VMEM block: two launches.
        loss_state = _mse_from_slab(ss, sh, n_s, rows_s)
        loss_image = _mse_from_slab(xs, ys, n_i, rows_i)

    loss = loss_state + loss_image  # trivial scalar add stays in plain JAX (glue)
    return loss, loss_state, loss_image


if __name__ == "__main__":
    key = jax.random.PRNGKey(0)
    k1, k2, k3, k4, k5, k6 = jax.random.split(key, 6)

    # Small shapes consistent with IM2IM: (batch, seq, state_dim) and
    # (batch, seq, C, H, W) image sequence (NCHW per frame).
    state = jax.random.normal(k1, (2, 8, 10), dtype=jnp.float32)
    state_hat = jax.random.normal(k2, (2, 8, 10), dtype=jnp.float32)
    image = jax.random.normal(k3, (2, 8, 3, 16, 16), dtype=jnp.float32)
    image_hat = jax.random.normal(k4, (2, 8, 3, 16, 16), dtype=jnp.float32)

    loss, loss_state, loss_image = im2im_loss(state, state_hat, image, image_hat)
    jax.block_until_ready((loss, loss_state, loss_image))

    # Sanity check against pure-JAX reference.
    ref_state = jnp.mean((state - state_hat) ** 2)
    ref_image = jnp.mean((image - image_hat) ** 2)
    assert jnp.allclose(loss_state, ref_state, rtol=1e-5, atol=1e-6)
    assert jnp.allclose(loss_image, ref_image, rtol=1e-5, atol=1e-6)
    assert jnp.allclose(loss, ref_state + ref_image, rtol=1e-5, atol=1e-6)

    # Also exercise the generic multi-tile path (ragged tail pad + masked last tile).
    a = jax.random.normal(k5, (2400, 131), dtype=jnp.float32)
    b = jax.random.normal(k6, (2400, 131), dtype=jnp.float32)
    got = mse_pallas(a, b)
    jax.block_until_ready(got)
    ref = jnp.mean((a - b) ** 2)
    assert jnp.allclose(got, ref, rtol=1e-4, atol=1e-6)

    print("KERNEL_OK")
</pallas_src>

<mosaic_0001>
module attributes {stable_mosaic.version = 11 : i64} {
  func.func @_im2im_kernel(%arg0: i32, %arg1: memref<1xi32, #tpu.memory_space<smem>>, %arg2: memref<2x128xf32, #tpu.memory_space<vmem>>, %arg3: memref<2x128xf32, #tpu.memory_space<vmem>>, %arg4: memref<96x128xf32, #tpu.memory_space<vmem>>, %arg5: memref<96x128xf32, #tpu.memory_space<vmem>>, %arg6: memref<2x1xf32, #tpu.memory_space<smem>>, %arg7: memref<96x128xf32, #tpu.memory_space<vmem>>) attributes {dimension_semantics = [#tpu.dimension_semantics<arbitrary>], iteration_bounds = array<i64: 1>, scalar_prefetch = 1 : i64, scratch_operands = 1 : i64, tpu.core_type = #tpu.core_type<tc>, window_params = [{pipeline_mode = #tpu.pipeline_mode<synchronous>, transform_indices = @transform_0, window_bounds = array<i64: 2, 128>}, {pipeline_mode = #tpu.pipeline_mode<synchronous>, transform_indices = @transform_1, window_bounds = array<i64: 2, 128>}, {transform_indices = @transform_2, window_bounds = array<i64: 96, 128>}, {transform_indices = @transform_3, window_bounds = array<i64: 96, 128>}, {transform_indices = @transform_4, window_bounds = array<i64: 2, 1>}]} {
    %c0_i32 = arith.constant 0 : i32
    %0 = arith.cmpi eq, %arg0, %c0_i32 : i32
    %1 = arith.extui %0 : i1 to i32
    %c0_i32_0 = arith.constant 0 : i32
    %2 = arith.cmpi ne, %1, %c0_i32_0 : i32
    scf.if %2 {
      %cst = arith.constant 0.000000e+00 : f32
      %19 = vector.broadcast %cst : f32 to vector<96x128xf32>
      %c0_11 = arith.constant 0 : index
      %c0_12 = arith.constant 0 : index
      %20 = vector.load %arg7[%c0_11, %c0_12] : memref<96x128xf32, #tpu.memory_space<vmem>>, vector<96x128xf32>
      tpu.vector_store %arg7[%c0_11, %c0_12], %19 {strides = array<i32>} : memref<96x128xf32, #tpu.memory_space<vmem>>, vector<96x128xf32>,
      %c0_13 = arith.constant 0 : index
      %c0_14 = arith.constant 0 : index
      %21 = vector.load %arg2[%c0_13, %c0_14] : memref<2x128xf32, #tpu.memory_space<vmem>>, vector<2x128xf32>
      %c0_15 = arith.constant 0 : index
      %c0_16 = arith.constant 0 : index
      %22 = vector.load %arg3[%c0_15, %c0_16] : memref<2x128xf32, #tpu.memory_space<vmem>>, vector<2x128xf32>
      %23 = arith.subf %21, %22 : vector<2x128xf32>
      %24 = arith.mulf %23, %23 : vector<2x128xf32>
      %25 = vector.shape_cast %24 : vector<2x128xf32> to vector<1x2x128xf32>
      %cst_17 = arith.constant dense<0.000000e+00> : vector<1xf32>
      %26 = vector.multi_reduction <add>, %25, %cst_17 [1, 2] : vector<1x2x128xf32> to vector<1xf32>
      %27 = vector.shape_cast %26 : vector<1xf32> to vector<1x1x1xf32>
      %28 = vector.extract %27[0, 0, 0] : f32 from vector<1x1x1xf32>
      %c0_18 = arith.constant 0 : index
      %c0_19 = arith.constant 0 : index
      %29 = memref.load %arg6[%c0_18, %c0_19] : memref<2x1xf32, #tpu.memory_space<smem>>
      memref.store %28, %arg6[%c0_18, %c0_19] : memref<2x1xf32, #tpu.memory_space<smem>>
    } else {
    }
    %c0 = arith.constant 0 : index
    %3 = memref.load %arg1[%c0] : memref<1xi32, #tpu.memory_space<smem>>
    %c96_i32 = arith.constant 96 : i32
    %4 = arith.muli %arg0, %c96_i32 : i32
    %5 = arith.subi %3, %4 : i32
    %c0_1 = arith.constant 0 : index
    %c0_2 = arith.constant 0 : index
    %6 = vector.load %arg4[%c0_1, %c0_2] : memref<96x128xf32, #tpu.memory_space<vmem>>, vector<96x128xf32>
    %c0_3 = arith.constant 0 : index
    %c0_4 = arith.constant 0 : index
    %7 = vector.load %arg5[%c0_3, %c0_4] : memref<96x128xf32, #tpu.memory_space<vmem>>, vector<96x128xf32>
    %8 = arith.subf %6, %7 : vector<96x128xf32>
    %9 = arith.mulf %8, %8 : vector<96x128xf32>
    %c96_i32_5 = arith.constant 96 : i32
    %10 = arith.cmpi sge, %5, %c96_i32_5 : i32
    %11 = arith.extui %10 : i1 to i32
    %c0_i32_6 = arith.constant 0 : i32
    %12 = arith.cmpi ne, %11, %c0_i32_6 : i32
    scf.if %12 {
      %c0_11 = arith.constant 0 : index
      %c0_12 = arith.constant 0 : index
      %19 = vector.load %arg7[%c0_11, %c0_12] : memref<96x128xf32, #tpu.memory_space<vmem>>, vector<96x128xf32>
      %20 = arith.addf %19, %9 : vector<96x128xf32>
      %c0_13 = arith.constant 0 : index
      %c0_14 = arith.constant 0 : index
      %21 = vector.load %arg7[%c0_13, %c0_14] : memref<96x128xf32, #tpu.memory_space<vmem>>, vector<96x128xf32>
      tpu.vector_store %arg7[%c0_13, %c0_14], %20 {strides = array<i32>} : memref<96x128xf32, #tpu.memory_space<vmem>>, vector<96x128xf32>,
    } else {
    }
    %c96_i32_7 = arith.constant 96 : i32
    %13 = arith.cmpi slt, %5, %c96_i32_7 : i32
    %14 = arith.extui %13 : i1 to i32
    %c0_i32_8 = arith.constant 0 : i32
    %15 = arith.cmpi ne, %14, %c0_i32_8 : i32
    scf.if %15 {
      %19 = tpu.iota {dimensions = array<i32: 0>} : vector<96x128xi32>
      %c0_11 = arith.constant 0 : index
      %c0_12 = arith.constant 0 : index
      %20 = vector.load %arg7[%c0_11, %c0_12] : memref<96x128xf32, #tpu.memory_space<vmem>>, vector<96x128xf32>
      %21 = vector.broadcast %5 : i32 to vector<96x128xi32>
      %22 = arith.cmpi slt, %19, %21 : vector<96x128xi32>
      %cst = arith.constant 0.000000e+00 : f32
      %23 = vector.broadcast %cst : f32 to vector<96x128xf32>
      %24 = arith.select %22, %9, %23 : vector<96x128xi1>, vector<96x128xf32>
      %25 = arith.addf %20, %24 : vector<96x128xf32>
      %c0_13 = arith.constant 0 : index
      %c0_14 = arith.constant 0 : index
      %26 = vector.load %arg7[%c0_13, %c0_14] : memref<96x128xf32, #tpu.memory_space<vmem>>, vector<96x128xf32>
      tpu.vector_store %arg7[%c0_13, %c0_14], %25 {strides = array<i32>} : memref<96x128xf32, #tpu.memory_space<vmem>>, vector<96x128xf32>,
    } else {
    }
    %c0_i32_9 = arith.constant 0 : i32
    %16 = arith.cmpi eq, %arg0, %c0_i32_9 : i32
    %17 = arith.extui %16 : i1 to i32
    %c0_i32_10 = arith.constant 0 : i32
    %18 = arith.cmpi ne, %17, %c0_i32_10 : i32
    scf.if %18 {
      %c0_11 = arith.constant 0 : index
      %c0_12 = arith.constant 0 : index
      %19 = vector.load %arg7[%c0_11, %c0_12] : memref<96x128xf32, #tpu.memory_space<vmem>>, vector<96x128xf32>
      %20 = vector.shape_cast %19 : vector<96x128xf32> to vector<1x96x128xf32>
      %cst = arith.constant dense<0.000000e+00> : vector<1xf32>
      %21 = vector.multi_reduction <add>, %20, %cst [1, 2] : vector<1x96x128xf32> to vector<1xf32>
      %22 = vector.shape_cast %21 : vector<1xf32> to vector<1x1x1xf32>
      %23 = vector.extract %22[0, 0, 0] : f32 from vector<1x1x1xf32>
      %c1 = arith.constant 1 : index
      %c0_13 = arith.constant 0 : index
      %24 = memref.load %arg6[%c1, %c0_13] : memref<2x1xf32, #tpu.memory_space<smem>>
      memref.store %23, %arg6[%c1, %c0_13] : memref<2x1xf32, #tpu.memory_space<smem>>
    } else {
    }
    return
  }
  func.func @transform_0(%arg0: i32, %arg1: memref<1xi32, #tpu.memory_space<smem>>) -> (i32, i32) {
    %c0_i32 = arith.constant 0 : i32
    %c0_i32_0 = arith.constant 0 : i32
    %c0_i32_1 = arith.constant 0 : i32
    return %c0_i32, %c0_i32_0 : i32, i32
  }
  func.func @transform_1(%arg0: i32, %arg1: memref<1xi32, #tpu.memory_space<smem>>) -> (i32, i32) {
    %c0_i32 = arith.constant 0 : i32
    %c0_i32_0 = arith.constant 0 : i32
    %c0_i32_1 = arith.constant 0 : i32
    return %c0_i32, %c0_i32_0 : i32, i32
  }
  func.func @transform_2(%arg0: i32, %arg1: memref<1xi32, #tpu.memory_space<smem>>) -> (i32, i32) {
    %c0_i32 = arith.constant 0 : i32
    %c0_i32_0 = arith.constant 0 : i32
    return %arg0, %c0_i32 : i32, i32
  }
  func.func @transform_3(%arg0: i32, %arg1: memref<1xi32, #tpu.memory_space<smem>>) -> (i32, i32) {
    %c0_i32 = arith.constant 0 : i32
    %c0_i32_0 = arith.constant 0 : i32
    return %arg0, %c0_i32 : i32, i32
  }
  func.func @transform_4(%arg0: i32, %arg1: memref<1xi32, #tpu.memory_space<smem>>) -> (i32, i32) {
    %c0_i32 = arith.constant 0 : i32
    %c0_i32_0 = arith.constant 0 : i32
    %c0_i32_1 = arith.constant 0 : i32
    return %c0_i32, %c0_i32_0 : i32, i32
  }
}

</mosaic_0001>

<bundles_post_ra>
// kernel: im2im_loss.1
= control target key start
LH: loop header
LB: loop body
LE: loop exit
PB: predicated region body
PF: predicated region fallthrough
CT: control target
= control target key end

     0   :  { %11 = vsyncpa [#allocation6], 0  ;;  %v296_v1 = vmov 0.0   ;;  %vm40_vm0 = vcmask 1041408   ;;  %s480_s0 = inlined_call_operand.<no memory space> [shape: s32[1], index: 0, kind: input, shape index: {}]   ;;  %s481_s1 = inlined_call_operand.vmem [shape: f32[2,128], index: 1, kind: input, shape index: {}]   ;;  %s482_s2 = inlined_call_operand.vmem [shape: f32[2,128], index: 2, kind: input, shape index: {}]   ;;  %s483_s3 = inlined_call_operand.vmem [shape: f32[96,128], index: 3, kind: input, shape index: {}]   ;;  %s484_s4 = inlined_call_operand.vmem [shape: f32[96,128], index: 4, kind: input, shape index: {}]   ;;  %s485_s5 = inlined_call_operand.vmem [shape: f32[2,1], index: 5, kind: output, shape index: {}]  }
   0x1   :  { %v36_v0 = vld [vmem:[%s481_s1] sm:$0x3]  ;;  %24 = vst [vmem:[#allocation2] sm:$0xff] %v296_v1  ;;  %25 = vst [vmem:[#allocation2 + $0x8] sm:$0xff] %v296_v1  ;;  %v57_v7 = vld [vmem:[%s483_s3 + $0x8] sm:$0xff]  ;;  %p274_p0 = scmp.lt.s32.totalorder %s480_s0, 96 }
   0x2   :  { %26 = vst [vmem:[#allocation2 + $0x10] sm:$0xff] %v296_v1  ;;  %27 = vst [vmem:[#allocation2 + $0x18] sm:$0xff] %v296_v1  ;;  %v37_v2 = vld [vmem:[%s482_s2] sm:$0x3]  ;;  %v58_v8 = vld [vmem:[%s483_s3 + $0x10] sm:$0xff] }
   0x3   :  { %28 = vst [vmem:[#allocation2 + $0x20] sm:$0xff] %v296_v1  ;;  %29 = vst [vmem:[#allocation2 + $0x28] sm:$0xff] %v296_v1  ;;  %v38_v3 = vsub.f32 %v36_v0, %v37_v2  ;;  %v56_v6 = vld [vmem:[%s483_s3] sm:$0xff]  ;;  %v59_v9 = vld [vmem:[%s483_s3 + $0x18] sm:$0xff] }
   0x4   :  { %30 = vst [vmem:[#allocation2 + $0x30] sm:$0xff] %v296_v1  ;;  %31 = vst [vmem:[#allocation2 + $0x38] sm:$0xff] %v296_v1  ;;  %v60_v10 = vld [vmem:[%s483_s3 + $0x20] sm:$0xff]  ;;  %v61_v11 = vld [vmem:[%s483_s3 + $0x28] sm:$0xff] }
   0x5   :  { %32 = vst [vmem:[#allocation2 + $0x40] sm:$0xff] %v296_v1  ;;  %33 = vst [vmem:[#allocation2 + $0x48] sm:$0xff] %v296_v1  ;;  %v39_v4 = vmul.f32 %v38_v3, %v38_v3  ;;  %v62_v12 = vld [vmem:[%s483_s3 + $0x30] sm:$0xff]  ;;  %v63_v13 = vld [vmem:[%s483_s3 + $0x38] sm:$0xff] }
   0x6   :  { %34 = vst [vmem:[#allocation2 + $0x50] sm:$0xff] %v296_v1  ;;  %35 = vst [vmem:[#allocation2 + $0x58] sm:$0xff] %v296_v1  ;;  %v64_v14 = vld [vmem:[%s483_s3 + $0x40] sm:$0xff]  ;;  %v65_v15 = vld [vmem:[%s483_s3 + $0x48] sm:$0xff] }
   0x7   :  { %v41_v5 = vsel %vm40_vm0, %v39_v4, 0.0  ;;  %v66_v16 = vld [vmem:[%s483_s3 + $0x50] sm:$0xff]  ;;  %v67_v17 = vld [vmem:[%s483_s3 + $0x58] sm:$0xff]  ;;  %v68_v18 = vld [vmem:[%s484_s4] sm:$0xff] }
   0x8   :  { %42 = vadd.xlane.f32.xlu0 %v41_v5  ;;  %v69_v19 = vld [vmem:[%s484_s4 + $0x8] sm:$0xff]  ;;  %v70_v20 = vld [vmem:[%s484_s4 + $0x10] sm:$0xff]  ;;  %v71_v21 = vld [vmem:[%s484_s4 + $0x18] sm:$0xff]  ;;  %v80_v24 = vsub.f32 %v56_v6, %v68_v18 }
   0x9   :  { %v72_v22 = vld [vmem:[%s484_s4 + $0x20] sm:$0xff]  ;;  %v73_v23 = vld [vmem:[%s484_s4 + $0x28] sm:$0xff]  ;;  %v81_v25 = vsub.f32 %v57_v7, %v69_v19  ;;  %v82_v26 = vsub.f32 %v58_v8, %v70_v20  ;;  %v74_v27 = vld [vmem:[%s484_s4 + $0x30] sm:$0xff]  ;;  %v83_v30 = vsub.f32 %v59_v9, %v71_v21 }
   0xa   :  { %v75_v28 = vld [vmem:[%s484_s4 + $0x38] sm:$0xff]  ;;  %v76_v29 = vld [vmem:[%s484_s4 + $0x40] sm:$0xff]  ;;  %v84_v31 = vsub.f32 %v60_v10, %v72_v22  ;;  %v85_v32 = vsub.f32 %v61_v11, %v73_v23  ;;  %v77_v33 = vld [vmem:[%s484_s4 + $0x48] sm:$0xff]  ;;  %v86_v36 = vsub.f32 %v62_v12, %v74_v27  ;;  %v406_v39 = vmul.f32 %v80_v24, %v80_v24 }
   0xb   :  { %v78_v34 = vld [vmem:[%s484_s4 + $0x50] sm:$0xff]  ;;  %v79_v35 = vld [vmem:[%s484_s4 + $0x58] sm:$0xff]  ;;  %v87_v37 = vsub.f32 %v63_v13, %v75_v28  ;;  %v88_v38 = vsub.f32 %v64_v14, %v76_v29  ;;  %v89_v40 = vsub.f32 %v65_v15, %v77_v33  ;;  %v408_v43 = vmul.f32 %v81_v25, %v81_v25  ;;  %v108_v61 = vld [vmem:[#allocation2] sm:$0xff] (!%p274_p0) }
   0xc   :  { %v90_v41 = vsub.f32 %v66_v16, %v78_v34  ;;  %v91_v42 = vsub.f32 %v67_v17, %v79_v35  ;;  %v410_v44 = vmul.f32 %v82_v26, %v82_v26  ;;  %v412_v45 = vmul.f32 %v83_v30, %v83_v30  ;;  %v109_v62 = vld [vmem:[#allocation2 + $0x8] sm:$0xff] (!%p274_p0)  ;;  %v110_v63 = vld [vmem:[#allocation2 + $0x10] sm:$0xff] (!%p274_p0)  ;;  %v111_v3 = vld [vmem:[#allocation2 + $0x18] sm:$0xff] (!%p274_p0) }
   0xd   :  { %v414_v46 = vmul.f32 %v84_v31, %v84_v31  ;;  %v416_v47 = vmul.f32 %v85_v32, %v85_v32  ;;  %v418_v48 = vmul.f32 %v86_v36, %v86_v36  ;;  %v420_v49 = vmul.f32 %v87_v37, %v87_v37  ;;  %v112_v4 = vld [vmem:[#allocation2 + $0x20] sm:$0xff] (!%p274_p0)  ;;  %v113_v5 = vld [vmem:[#allocation2 + $0x28] sm:$0xff] (!%p274_p0)  ;;  %v114_v9 = vld [vmem:[#allocation2 + $0x30] sm:$0xff] (!%p274_p0) }
   0xe   :  { %v422_v50 = vmul.f32 %v88_v38, %v88_v38  ;;  %v424_v51 = vmul.f32 %v89_v40, %v89_v40  ;;  %v426_v52 = vmul.f32 %v90_v41, %v90_v41  ;;  %v428_v53 = vmul.f32 %v91_v42, %v91_v42  ;;  %v115_v10 = vld [vmem:[#allocation2 + $0x38] sm:$0xff] (!%p274_p0)  ;;  %v116_v11 = vld [vmem:[#allocation2 + $0x40] sm:$0xff] (!%p274_p0)  ;;  %v117_v15 = vld [vmem:[#allocation2 + $0x48] sm:$0xff] (!%p274_p0) }
   0xf   :  { %v120_v0 = vadd.f32 (!%p274_p0), %v108_v61, %v406_v39  ;;  %v121_v1 = vadd.f32 (!%p274_p0), %v109_v62, %v408_v43  ;;  %v122_v2 = vadd.f32 (!%p274_p0), %v110_v63, %v410_v44  ;;  %v123_v6 = vadd.f32 (!%p274_p0), %v111_v3, %v412_v45  ;;  %v118_v16 = vld [vmem:[#allocation2 + $0x50] sm:$0xff] (!%p274_p0)  ;;  %v119_v17 = vld [vmem:[#allocation2 + $0x58] sm:$0xff] (!%p274_p0) }
  0x10   :  { %v124_v7 = vadd.f32 (!%p274_p0), %v112_v4, %v414_v46  ;;  %v125_v8 = vadd.f32 (!%p274_p0), %v113_v5, %v416_v47  ;;  %v126_v12 = vadd.f32 (!%p274_p0), %v114_v9, %v418_v48  ;;  %v127_v13 = vadd.f32 (!%p274_p0), %v115_v10, %v420_v49 }
  0x11   :  { %132 = vst [vmem:[#allocation2] sm:$0xff] (!%p274_p0), %v120_v0  ;;  %133 = vst [vmem:[#allocation2 + $0x8] sm:$0xff] (!%p274_p0), %v121_v1  ;;  %v128_v14 = vadd.f32 (!%p274_p0), %v116_v11, %v422_v50  ;;  %v129_v18 = vadd.f32 (!%p274_p0), %v117_v15, %v424_v51  ;;  %v130_v19 = vadd.f32 (!%p274_p0), %v118_v16, %v426_v52 }
  0x12   :  { %134 = vst [vmem:[#allocation2 + $0x10] sm:$0xff] (!%p274_p0), %v122_v2  ;;  %135 = vst [vmem:[#allocation2 + $0x18] sm:$0xff] (!%p274_p0), %v123_v6  ;;  %v131_v20 = vadd.f32 (!%p274_p0), %v119_v17, %v428_v53 }
  0x13   :  { %136 = vst [vmem:[#allocation2 + $0x20] sm:$0xff] (!%p274_p0), %v124_v7  ;;  %137 = vst [vmem:[#allocation2 + $0x28] sm:$0xff] (!%p274_p0), %v125_v8 }
  0x14   :  { %138 = vst [vmem:[#allocation2 + $0x30] sm:$0xff] (!%p274_p0), %v126_v12  ;;  %139 = vst [vmem:[#allocation2 + $0x38] sm:$0xff] (!%p274_p0), %v127_v13 }
  0x15   :  { %140 = vst [vmem:[#allocation2 + $0x40] sm:$0xff] (!%p274_p0), %v128_v14  ;;  %141 = vst [vmem:[#allocation2 + $0x48] sm:$0xff] (!%p274_p0), %v129_v18 }
  0x16   :  { %142 = vst [vmem:[#allocation2 + $0x50] sm:$0xff] (!%p274_p0), %v130_v19  ;;  %143 = vst [vmem:[#allocation2 + $0x58] sm:$0xff] (!%p274_p0), %v131_v20 }
  0x95   :  { %v43_v54 = vpop.xlane.xlu0 %42 }
  0x96   :  { %v44_v55 = vrot.slane %v43_v54, 4 }
  0x98   :  { %v45_v56 = vadd.f32 %v44_v55, %v43_v54 }
  0x9a   :  { %v46_v57 = vrot.slane %v45_v56, 2 }
  0x9c   :  { %v47_v58 = vadd.f32 %v46_v57, %v45_v56 }
  0x9e   :  { %v48_v59 = vrot.slane %v47_v58, 1 }
  0xa0   :  { %v49_v60 = vadd.f32 %v48_v59, %v47_v58 }
  0xa2   :  { %276 = vpush %v49_v60 }
  0xce   :  { %107 = sbr.rel (%p274_p0) target bundleno = 213 (0xd5), region = 25 }
  0xd3   :  { %s277_s4 = spop %276 }
  0xd4   :  { %52 = sst [smem:[#allocation5]] %s277_s4 }
  0xd5 PF:  { %p275_p1 = scmp.ge.s32.totalorder %s480_s0, 96 }
  0xd6   :  { %v148_v21 = vlaneseq (!%p275_p1)  ;;  %v451_v22 = vstv (!%p275_p1), %s480_s0  ;;  %v161_v24 = vld [vmem:[#allocation2] sm:$0xff] (!%p275_p1)  ;;  %v162_v26 = vld [vmem:[#allocation2 + $0x8] sm:$0xff] (!%p275_p1)  ;;  %v163_v30 = vld [vmem:[#allocation2 + $0x10] sm:$0xff] (!%p275_p1) }
  0xd7   :  { %147 = sbr.rel (%p275_p1) target bundleno = 233 (0xe9), region = 29  ;;  %v164_v31 = vld [vmem:[#allocation2 + $0x18] sm:$0xff] (!%p275_p1)  ;;  %v165_v36 = vld [vmem:[#allocation2 + $0x20] sm:$0xff] (!%p275_p1)  ;;  %v166_v55 = vld [vmem:[#allocation2 + $0x28] sm:$0xff] (!%p275_p1) }
  0xd8   :  { %v149_v23 = vshrl.u32 (!%p275_p1), %v148_v21, 7  ;;  %v167_v56 = vld [vmem:[#allocation2 + $0x30] sm:$0xff] (!%p275_p1)  ;;  %v168_v58 = vld [vmem:[#allocation2 + $0x38] sm:$0xff] (!%p275_p1)  ;;  %v169_v62 = vld [vmem:[#allocation2 + $0x40] sm:$0xff] (!%p275_p1) }
  0xd9   :  { %v170_v63 = vld [vmem:[#allocation2 + $0x48] sm:$0xff] (!%p275_p1)  ;;  %v172_v5 = vld [vmem:[#allocation2 + $0x58] sm:$0xff] (!%p275_p1) }
  0xda   :  { %vm174_vm1 = vcmp.lt.s32.totalorder (!%p275_p1), %v149_v23, %v451_v22  ;;  %v150_v25 = vadd.s32 (!%p275_p1), 8, %v149_v23  ;;  %v151_v27 = vadd.s32 (!%p275_p1), 16, %v149_v23  ;;  %v152_v28 = vadd.s32 (!%p275_p1), 24, %v149_v23 }
  0xdb   :  { %v186_v29 = vsel (!%p275_p1), %vm174_vm1, %v406_v39, 0.0  ;;  %v153_v32 = vadd.s32 (!%p275_p1), 32, %v149_v23  ;;  %v154_v33 = vadd.s32 (!%p275_p1), 40, %v149_v23  ;;  %v155_v34 = vadd.s32 (!%p275_p1), 48, %v149_v23 }
  0xdc   :  { %v198_v35 = vadd.f32 (!%p275_p1), %v186_v29, %v161_v24  ;;  %vm175_vm2 = vcmp.lt.s32.totalorder (!%p275_p1), %v150_v25, %v451_v22  ;;  %vm176_vm3 = vcmp.lt.s32.totalorder (!%p275_p1), %v151_v27, %v451_v22  ;;  %vm177_vm4 = vcmp.lt.s32.totalorder (!%p275_p1), %v152_v28, %v451_v22 }
  0xdd   :  { %v187_v37 = vsel (!%p275_p1), %vm175_vm2, %v408_v43, 0.0  ;;  %v188_v38 = vsel (!%p275_p1), %vm176_vm3, %v410_v44, 0.0  ;;  %v189_v40 = vsel (!%p275_p1), %vm177_vm4, %v412_v45, 0.0  ;;  %vm178_vm5 = vcmp.lt.s32.totalorder (!%p275_p1), %v153_v32, %v451_v22 }
  0xde   :  { %210 = vst [vmem:[#allocation2] sm:$0xff] %v198_v35  ;;  %v199_v39 = vadd.f32 %v187_v37, %v162_v26  ;;  %v200_v41 = vadd.f32 %v188_v38, %v163_v30  ;;  %v201_v42 = vadd.f32 %v189_v40, %v164_v31  ;;  %v190_v54 = vsel %vm178_vm5, %v414_v46, 0.0 }
  0xdf   :  { %v202_v57 = vadd.f32 %v190_v54, %v165_v36  ;;  %vm179_vm6 = vcmp.lt.s32.totalorder %v154_v33, %v451_v22  ;;  %vm180_vm7 = vcmp.lt.s32.totalorder %v155_v34, %v451_v22  ;;  %v156_v43 = vadd.s32 56, %v149_v23 }
  0xe0   :  { %211 = vst [vmem:[#allocation2 + $0x8] sm:$0xff] %v199_v39  ;;  %212 = vst [vmem:[#allocation2 + $0x10] sm:$0xff] %v200_v41  ;;  %v191_v44 = vsel %vm179_vm6, %v416_v47, 0.0  ;;  %v192_v45 = vsel %vm180_vm7, %v418_v48, 0.0  ;;  %v157_v59 = vadd.s32 64, %v149_v23  ;;  %v158_v60 = vadd.s32 72, %v149_v23 }
  0xe1   :  { %213 = vst [vmem:[#allocation2 + $0x18] sm:$0xff] %v201_v42  ;;  %214 = vst [vmem:[#allocation2 + $0x20] sm:$0xff] %v202_v57  ;;  %v203_v46 = vadd.f32 %v191_v44, %v166_v55  ;;  %v204_v61 = vadd.f32 %v192_v45, %v167_v56  ;;  %vm181_vm8 = vcmp.lt.s32.totalorder %v156_v43, %v451_v22  ;;  %v159_v0 = vadd.s32 80, %v149_v23  ;;  %v171_v47 = vld [vmem:[#allocation2 + $0x50] sm:$0xff] }
  0xe2   :  { %v193_v1 = vsel %vm181_vm8, %v420_v49, 0.0  ;;  %vm182_vm9 = vcmp.lt.s32.totalorder %v157_v59, %v451_v22  ;;  %vm183_vm10 = vcmp.lt.s32.totalorder %v158_v60, %v451_v22  ;;  %v160_v2 = vadd.s32 88, %v149_v23 }
  0xe3   :  { %215 = vst [vmem:[#allocation2 + $0x28] sm:$0xff] %v203_v46  ;;  %216 = vst [vmem:[#allocation2 + $0x30] sm:$0xff] %v204_v61  ;;  %v205_v48 = vadd.f32 %v193_v1, %v168_v58  ;;  %v194_v3 = vsel %vm182_vm9, %v422_v50, 0.0  ;;  %v195_v4 = vsel %vm183_vm10, %v424_v51, 0.0  ;;  %vm184_vm11 = vcmp.lt.s32.totalorder %v159_v0, %v451_v22 }
  0xe4   :  { %v206_v6 = vadd.f32 %v194_v3, %v169_v62  ;;  %v207_v7 = vadd.f32 %v195_v4, %v170_v63  ;;  %v196_v49 = vsel %vm184_vm11, %v426_v52, 0.0  ;;  %vm185_vm12 = vcmp.lt.s32.totalorder %v160_v2, %v451_v22 }
  0xe5   :  { %217 = vst [vmem:[#allocation2 + $0x38] sm:$0xff] %v205_v48  ;;  %v208_v8 = vadd.f32 %v196_v49, %v171_v47  ;;  %v197_v9 = vsel %vm185_vm12, %v428_v53, 0.0 }
  0xe6   :  { %218 = vst [vmem:[#allocation2 + $0x40] sm:$0xff] %v206_v6  ;;  %219 = vst [vmem:[#allocation2 + $0x48] sm:$0xff] %v207_v7  ;;  %v209_v10 = vadd.f32 %v197_v9, %v172_v5 }
  0xe7   :  { %220 = vst [vmem:[#allocation2 + $0x50] sm:$0xff] %v208_v8 }
  0xe8   :  { %221 = vst [vmem:[#allocation2 + $0x58] sm:$0xff] %v209_v10 }
  0xe9 PF:  { %v226_v51 = vld [vmem:[#allocation2 + $0x8] sm:$0xff]  ;;  %v227_v11 = vld [vmem:[#allocation2 + $0x10] sm:$0xff]  ;;  %v228_v13 = vld [vmem:[#allocation2 + $0x18] sm:$0xff]  ;;  %s265_s1 = sshll.u32 %s485_s5, 4  ;;  %s266_s1 = int_to_ptr.vmem [resolvable:$true] %s265_s1 }
  0xea   :  { %v229_v15 = vld [vmem:[#allocation2 + $0x20] sm:$0xff]  ;;  %v230_v16 = vld [vmem:[#allocation2 + $0x28] sm:$0xff]  ;;  %v231_v18 = vld [vmem:[#allocation2 + $0x30] sm:$0xff]  ;;  %s282_s23 = scalar_lea.vmem %s266_s1, 32  ;;  %p287_p3 = scmp.lt.s32.totalorder %s266_s1, %s266_s1 }
  0xeb   :  { %p283_p2 = scmp.ne.s32.totalorder %s266_s1, %s282_s23  ;;  %p288_p4 = scmp.lt.s32.totalorder %s282_s23, %s282_s23 }
  0xec   :  { %v232_v20 = vld [vmem:[#allocation2 + $0x38] sm:$0xff] }
  0xed   :  { %v233_v21 = vld [vmem:[#allocation2 + $0x40] sm:$0xff]  ;;  %v234_v23 = vld [vmem:[#allocation2 + $0x48] sm:$0xff]  ;;  %p289_p5 = por %p288_p4, %p287_p3 }
  0xee   :  { %v235_v25 = vld [vmem:[#allocation2 + $0x50] sm:$0xff] }
  0xef   :  { %v236_v27 = vld [vmem:[#allocation2 + $0x58] sm:$0xff]  ;;  %p290_p6 = pnand %p289_p5, %p283_p2 }
  0xf0   :  { %v225_v50 = vld [vmem:[#allocation2] sm:$0xff] }
  0xf1   :  { %v237_v12 = vadd.f32 %v226_v51, %v225_v50 }
  0xf3   :  { %v238_v14 = vadd.f32 %v237_v12, %v227_v11 }
  0xf5   :  { %v239_v52 = vadd.f32 %v238_v14, %v228_v13 }
  0xf7   :  { %v240_v17 = vadd.f32 %v239_v52, %v229_v15 }
  0xf9   :  { %v241_v19 = vadd.f32 %v240_v17, %v230_v16 }
  0xfb   :  { %v242_v53 = vadd.f32 %v241_v19, %v231_v18 }
  0xfd   :  { %v243_v22 = vadd.f32 %v242_v53, %v232_v20 }
  0xff   :  { %v244_v24 = vadd.f32 %v243_v22, %v233_v21 }
 0x101   :  { %v245_v26 = vadd.f32 %v244_v24, %v234_v23 }
 0x103   :  { %v246_v28 = vadd.f32 %v245_v26, %v235_v25 }
 0x105   :  { %v247_v29 = vadd.f32 %v246_v28, %v236_v27 }
 0x107   :  { %248 = vadd.xlane.f32.xlu0 %v247_v29 }
 0x194   :  { %v249_v30 = vpop.xlane.xlu0 %248 }
 0x195   :  { %v250_v31 = vrot.slane %v249_v30, 4 }
 0x197   :  { %v251_v32 = vadd.f32 %v250_v31, %v249_v30 }
 0x199   :  { %v252_v33 = vrot.slane %v251_v32, 2 }
 0x19b   :  { %v253_v34 = vadd.f32 %v252_v33, %v251_v32 }
 0x19d   :  { %v254_v35 = vrot.slane %v253_v34, 1 }
 0x19f   :  { %v255_v36 = vadd.f32 %v254_v35, %v253_v34 }
 0x1a1   :  { %278 = vpush %v255_v36 }
 0x1d2   :  { %s279_s22 = spop %278 }
 0x1d3   :  { %258 = sst [smem:[#allocation5 + $0x80]] %s279_s22 }
 0x1d4   :  { %293 = shalt.err (!%p290_p6)
}
 0x1d5   :  { %s297_s24 = smov [#allocation5]  }
 0x1d6   :  { %268 = dma.smem_to_vmem %s297_s24, 32, %s266_s1, [#allocation6]  }
 0x1d7   :  { %294 = dma.done.wait [#allocation6], 32  }
 0x1d8   :  { %295 = vsyncadd [#allocation6], 4294967264 }
 0x1d9   :  { %272 = sfence }
 0x1da   :  { %273 = vsyncpa [#allocation6], 1 }

</bundles_post_ra>
